<compile_context>
chip_gen: v7x
topology: tpu7x:2x2x1
jax: 0.10.0
libtpu: 0.0.40
codegen_flags: <defaults>
</compile_context>

<pallas_src>
import functools

import jax
import jax.numpy as jnp
from jax.experimental import pallas as pl
from jax.experimental.pallas import tpu as pltpu


def _round_up(x, m):
    return ((x + m - 1) // m) * m


def actor_critic_kernel(x_ref, wfc_ref, bfc_ref, wh_ref, bh_ref, out_ref, *, n_out):
    # x: (TILE_B, n_in_p); wfc: (n_in_p, n_hid_p); wh: (n_hid_p, 128) with
    # action weights in cols [:n_out], value weights in col n_out, zeros after.
    x = x_ref[...]

    # fc + ReLU (MXU matmul, f32 accumulation; elementwise stays f32 for v5e).
    h = jnp.dot(x, wfc_ref[...], preferred_element_type=jnp.float32) + bfc_ref[...]
    h = jnp.maximum(h, 0.0)

    # Fused action + value heads: one MXU matmul produces a (TILE_B, 128) slab.
    head = (
        jnp.dot(h.astype(wh_ref.dtype), wh_ref[...], preferred_element_type=jnp.float32)
        + bh_ref[...]
    )

    lane = jax.lax.broadcasted_iota(jnp.int32, head.shape, 1)
    is_action = lane < n_out

    # Numerically stable softmax over the n_out valid action columns only.
    logits = jnp.where(is_action, head, -1e30)
    m = jnp.max(logits, axis=-1, keepdims=True)
    e = jnp.exp(logits - m)                       # padded lanes -> exactly 0
    denom = jnp.sum(e, axis=-1, keepdims=True)
    r = pl.reciprocal(denom, approx=True)         # EUP vrcp (free slot)
    r = r * (2.0 - denom * r)                     # one NR step -> ~f32 precision
    probs = e * r

    # Lane-dense output: probs in [:, :n_out], raw value in [:, n_out], 0 after.
    out_ref[...] = jnp.where(lane == n_out, head, probs)


def prepare_params(params, compute_dtype=jnp.float32):
    """Pad / transpose / fuse torch-convention params once, at prep time."""
    n_hidden, n_input = params["w_fc"].shape
    n_out = params["w_action"].shape[0]

    n_in_p = _round_up(max(n_input, 1), 128)
    n_hid_p = _round_up(max(n_hidden, 1), 128)
    head_p = _round_up(n_out + 1, 128)

    wfc = jnp.zeros((n_in_p, n_hid_p), compute_dtype)
    wfc = wfc.at[:n_input, :n_hidden].set(params["w_fc"].T.astype(compute_dtype))
    bfc = jnp.zeros((1, n_hid_p), jnp.float32).at[0, :n_hidden].set(params["b_fc"])

    # Fuse action (n_out cols) and value (1 col) heads into one weight/bias.
    wh = jnp.zeros((n_hid_p, head_p), compute_dtype)
    wh = wh.at[:n_hidden, :n_out].set(params["w_action"].T.astype(compute_dtype))
    wh = wh.at[:n_hidden, n_out].set(params["w_value"][0].astype(compute_dtype))
    bh = jnp.zeros((1, head_p), jnp.float32)
    bh = bh.at[0, :n_out].set(params["b_action"])
    bh = bh.at[0, n_out].set(params["b_value"][0])

    return {
        "wfc": wfc, "bfc": bfc, "wh": wh, "bh": bh,
        "n_input": n_input, "n_out": n_out,
        "n_in_p": n_in_p, "head_p": head_p,
        "compute_dtype": compute_dtype,
    }


def actor_critic_forward(x, prep, tile_b=512):
    """x: (B, n_input) float32 -> (probs (B, n_out), values (B, 1)) float32."""
    B = x.shape[0]
    n_in_p, head_p, n_out = prep["n_in_p"], prep["head_p"], prep["n_out"]
    cdt = prep["compute_dtype"]

    # 16-row multiple satisfies both f32 (8) and bf16 (16) sublane tiling.
    tile = min(tile_b, _round_up(B, 16))
    b_pad = _round_up(B, tile)

    xp = jnp.zeros((b_pad, n_in_p), cdt)
    xp = xp.at[:B, : prep["n_input"]].set(x.astype(cdt))

    grid = (pl.cdiv(b_pad, tile),)
    kernel = functools.partial(actor_critic_kernel, n_out=n_out)

    out = pl.pallas_call(
        kernel,
        out_shape=jax.ShapeDtypeStruct((b_pad, head_p), jnp.float32),
        grid=grid,
        in_specs=[
            pl.BlockSpec((tile, n_in_p), lambda i: (i, 0)),        # x: tiled over batch
            pl.BlockSpec(prep["wfc"].shape, lambda i: (0, 0)),     # weights: VMEM-resident
            pl.BlockSpec(prep["bfc"].shape, lambda i: (0, 0)),
            pl.BlockSpec(prep["wh"].shape, lambda i: (0, 0)),
            pl.BlockSpec(prep["bh"].shape, lambda i: (0, 0)),
        ],
        out_specs=pl.BlockSpec((tile, head_p), lambda i: (i, 0)),  # lane-dense slab
        compiler_params=pltpu.CompilerParams(
            dimension_semantics=("parallel",),                     # 2 TCs on v7x
        ),
    )(xp, prep["wfc"], prep["bfc"], prep["wh"], prep["bh"])

    probs = out[:B, :n_out]
    values = out[:B, n_out:n_out + 1]
    return probs, values


def init_params(key, n_input, n_output, n_hidden):
    """Deterministic init mirroring nn.Linear default (uniform +/- 1/sqrt(fan_in))."""
    ks = jax.random.split(key, 6)

    def lin(kw, kb, fan_in, fan_out):
        bound = 1.0 / jnp.sqrt(fan_in)
        w = jax.random.uniform(kw, (fan_out, fan_in), jnp.float32, -bound, bound)
        b = jax.random.uniform(kb, (fan_out,), jnp.float32, -bound, bound)
        return w, b

    w_fc, b_fc = lin(ks[0], ks[1], n_input, n_hidden)
    w_a, b_a = lin(ks[2], ks[3], n_hidden, n_output)
    w_v, b_v = lin(ks[4], ks[5], n_hidden, 1)
    return {
        "w_fc": w_fc, "b_fc": b_fc,
        "w_action": w_a, "b_action": b_a,
        "w_value": w_v, "b_value": b_v,
    }


def reference_forward(x, p):
    h = jax.nn.relu(x @ p["w_fc"].T + p["b_fc"])
    probs = jax.nn.softmax(h @ p["w_action"].T + p["b_action"], axis=-1)
    values = h @ p["w_value"].T + p["b_value"]
    return probs, values


if __name__ == "__main__":
    n_input, n_output, n_hidden = 4, 2, 32   # CartPole-style actor-critic
    B = 2

    key = jax.random.PRNGKey(0)
    k_x, k_p = jax.random.split(key)
    x = jax.random.normal(k_x, (B, n_input), jnp.float32)
    params = init_params(k_p, n_input, n_output, n_hidden)

    ref_probs, ref_values = reference_forward(x, params)

    # --- f32 compute path (exact check) ---
    prep_f32 = prepare_params(params, jnp.float32)
    probs, values = actor_critic_forward(x, prep_f32)
    jax.block_until_ready((probs, values))
    assert probs.shape == (B, n_output) and values.shape == (B, 1)
    assert jnp.allclose(probs, ref_probs, atol=1e-5, rtol=1e-5)
    assert jnp.allclose(values, ref_values, atol=1e-5, rtol=1e-5)
    assert jnp.allclose(jnp.sum(probs, axis=-1), 1.0, atol=1e-5)

    # --- bf16 MXU/bandwidth path (looser tolerance, f32 accumulation) ---
    prep_bf16 = prepare_params(params, jnp.bfloat16)
    probs16, values16 = actor_critic_forward(x, prep_bf16)
    jax.block_until_ready((probs16, values16))
    assert jnp.allclose(probs16, ref_probs, atol=3e-2, rtol=3e-2)
    assert jnp.allclose(values16, ref_values, atol=3e-2, rtol=3e-2)
    assert jnp.allclose(jnp.sum(probs16, axis=-1), 1.0, atol=1e-3)

    print("KERNEL_OK")
</pallas_src>

<mosaic_0001>
module attributes {stable_mosaic.version = 11 : i64} {
  func.func @actor_critic_kernel(%arg0: i32, %arg1: memref<16x128xf32, #tpu.memory_space<vmem>>, %arg2: memref<128x128xf32, #tpu.memory_space<vmem>>, %arg3: memref<1x128xf32, #tpu.memory_space<vmem>>, %arg4: memref<128x128xf32, #tpu.memory_space<vmem>>, %arg5: memref<1x128xf32, #tpu.memory_space<vmem>>, %arg6: memref<16x128xf32, #tpu.memory_space<vmem>>) attributes {dimension_semantics = [#tpu.dimension_semantics<parallel>], iteration_bounds = array<i64: 1>, scalar_prefetch = 0 : i64, scratch_operands = 0 : i64, tpu.core_type = #tpu.core_type<tc>, window_params = [{transform_indices = @transform_0, window_bounds = array<i64: 16, 128>}, {pipeline_mode = #tpu.pipeline_mode<synchronous>, transform_indices = @transform_1, window_bounds = array<i64: 128, 128>}, {pipeline_mode = #tpu.pipeline_mode<synchronous>, transform_indices = @transform_2, window_bounds = array<i64: 1, 128>}, {pipeline_mode = #tpu.pipeline_mode<synchronous>, transform_indices = @transform_3, window_bounds = array<i64: 128, 128>}, {pipeline_mode = #tpu.pipeline_mode<synchronous>, transform_indices = @transform_4, window_bounds = array<i64: 1, 128>}, {transform_indices = @transform_5, window_bounds = array<i64: 16, 128>}]} {
    %c0 = arith.constant 0 : index
    %c0_0 = arith.constant 0 : index
    %0 = vector.load %arg1[%c0, %c0_0] : memref<16x128xf32, #tpu.memory_space<vmem>>, vector<16x128xf32>
    %c0_1 = arith.constant 0 : index
    %c0_2 = arith.constant 0 : index
    %1 = vector.load %arg2[%c0_1, %c0_2] : memref<128x128xf32, #tpu.memory_space<vmem>>, vector<128x128xf32>
    %cst = arith.constant dense<0.000000e+00> : vector<16x128xf32>
    %2 = tpu.matmul %0, %1, %cst {dimension_numbers = #tpu.dot_dimension_numbers<[1], [0], [0], [1], [0, 0, 1, 1], [], []>} : vector<16x128xf32>, vector<128x128xf32>, vector<16x128xf32> -> vector<16x128xf32>
    %c0_3 = arith.constant 0 : index
    %c0_4 = arith.constant 0 : index
    %3 = vector.load %arg3[%c0_3, %c0_4] : memref<1x128xf32, #tpu.memory_space<vmem>>, vector<1x128xf32>
    %4 = vector.broadcast %3 : vector<1x128xf32> to vector<16x128xf32>
    %5 = arith.addf %2, %4 : vector<16x128xf32>
    %cst_5 = arith.constant 0.000000e+00 : f32
    %6 = vector.broadcast %cst_5 : f32 to vector<16x128xf32>
    %7 = arith.maximumf %5, %6 : vector<16x128xf32>
    %c0_6 = arith.constant 0 : index
    %c0_7 = arith.constant 0 : index
    %8 = vector.load %arg4[%c0_6, %c0_7] : memref<128x128xf32, #tpu.memory_space<vmem>>, vector<128x128xf32>
    %cst_8 = arith.constant dense<0.000000e+00> : vector<16x128xf32>
    %9 = tpu.matmul %7, %8, %cst_8 {dimension_numbers = #tpu.dot_dimension_numbers<[1], [0], [0], [1], [0, 0, 1, 1], [], []>} : vector<16x128xf32>, vector<128x128xf32>, vector<16x128xf32> -> vector<16x128xf32>
    %c0_9 = arith.constant 0 : index
    %c0_10 = arith.constant 0 : index
    %10 = vector.load %arg5[%c0_9, %c0_10] : memref<1x128xf32, #tpu.memory_space<vmem>>, vector<1x128xf32>
    %11 = vector.broadcast %10 : vector<1x128xf32> to vector<16x128xf32>
    %12 = arith.addf %9, %11 : vector<16x128xf32>
    %13 = tpu.iota {dimensions = array<i32: 1>} : vector<16x128xi32>
    %c2_i32 = arith.constant 2 : i32
    %14 = vector.broadcast %c2_i32 : i32 to vector<16x128xi32>
    %15 = arith.cmpi slt, %13, %14 : vector<16x128xi32>
    %cst_11 = arith.constant -1.000000e+30 : f32
    %16 = vector.broadcast %cst_11 : f32 to vector<16x128xf32>
    %17 = arith.select %15, %12, %16 : vector<16x128xi1>, vector<16x128xf32>
    %cst_12 = arith.constant dense<0xFF800000> : vector<16xf32>
    %18 = vector.multi_reduction <maximumf>, %17, %cst_12 [1] : vector<16x128xf32> to vector<16xf32>
    %19 = vector.shape_cast %18 : vector<16xf32> to vector<16x1xf32>
    %20 = vector.broadcast %19 : vector<16x1xf32> to vector<16x128xf32>
    %21 = arith.subf %17, %20 : vector<16x128xf32>
    %22 = math.exp %21 : vector<16x128xf32>
    %cst_13 = arith.constant dense<0.000000e+00> : vector<16xf32>
    %23 = vector.multi_reduction <add>, %22, %cst_13 [1] : vector<16x128xf32> to vector<16xf32>
    %24 = vector.shape_cast %23 : vector<16xf32> to vector<16x1xf32>
    %25 = tpu.reciprocal %24 {approx = true} : vector<16x1xf32> -> vector<16x1xf32>
    %26 = arith.mulf %24, %25 : vector<16x1xf32>
    %cst_14 = arith.constant 2.000000e+00 : f32
    %27 = vector.broadcast %cst_14 : f32 to vector<16x1xf32>
    %28 = arith.subf %27, %26 : vector<16x1xf32>
    %29 = arith.mulf %25, %28 : vector<16x1xf32>
    %30 = vector.broadcast %29 : vector<16x1xf32> to vector<16x128xf32>
    %31 = arith.mulf %22, %30 : vector<16x128xf32>
    %c2_i32_15 = arith.constant 2 : i32
    %32 = vector.broadcast %c2_i32_15 : i32 to vector<16x128xi32>
    %33 = arith.cmpi eq, %13, %32 : vector<16x128xi32>
    %34 = arith.select %33, %12, %31 : vector<16x128xi1>, vector<16x128xf32>
    %c0_16 = arith.constant 0 : index
    %c0_17 = arith.constant 0 : index
    %35 = vector.load %arg6[%c0_16, %c0_17] : memref<16x128xf32, #tpu.memory_space<vmem>>, vector<16x128xf32>
    tpu.vector_store %arg6[%c0_16, %c0_17], %34 {strides = array<i32>} : memref<16x128xf32, #tpu.memory_space<vmem>>, vector<16x128xf32>,
    return
  }
  func.func @transform_0(%arg0: i32) -> (i32, i32) {
    %c0_i32 = arith.constant 0 : i32
    %c0_i32_0 = arith.constant 0 : i32
    return %arg0, %c0_i32 : i32, i32
  }
  func.func @transform_1(%arg0: i32) -> (i32, i32) {
    %c0_i32 = arith.constant 0 : i32
    %c0_i32_0 = arith.constant 0 : i32
    %c0_i32_1 = arith.constant 0 : i32
    return %c0_i32, %c0_i32_0 : i32, i32
  }
  func.func @transform_2(%arg0: i32) -> (i32, i32) {
    %c0_i32 = arith.constant 0 : i32
    %c0_i32_0 = arith.constant 0 : i32
    %c0_i32_1 = arith.constant 0 : i32
    return %c0_i32, %c0_i32_0 : i32, i32
  }
  func.func @transform_3(%arg0: i32) -> (i32, i32) {
    %c0_i32 = arith.constant 0 : i32
    %c0_i32_0 = arith.constant 0 : i32
    %c0_i32_1 = arith.constant 0 : i32
    return %c0_i32, %c0_i32_0 : i32, i32
  }
  func.func @transform_4(%arg0: i32) -> (i32, i32) {
    %c0_i32 = arith.constant 0 : i32
    %c0_i32_0 = arith.constant 0 : i32
    %c0_i32_1 = arith.constant 0 : i32
    return %c0_i32, %c0_i32_0 : i32, i32
  }
  func.func @transform_5(%arg0: i32) -> (i32, i32) {
    %c0_i32 = arith.constant 0 : i32
    %c0_i32_0 = arith.constant 0 : i32
    return %arg0, %c0_i32 : i32, i32
  }
}

</mosaic_0001>

<bundles_post_ra>
// kernel: tpu_custom_call.1
= control target key start
LH: loop header
LB: loop body
LE: loop exit
PB: predicated region body
PF: predicated region fallthrough
CT: control target
= control target key end

     0   :  { %10 = vsyncpa [#allocation3], 0  ;;  %s703_s0 = inlined_call_operand.hbm [shape: f32[16,128], index: 0, kind: input, shape index: {}]   ;;  %s704_s1 = inlined_call_operand.hbm [shape: f32[128,128], index: 1, kind: input, shape index: {}]   ;;  %s705_s2 = inlined_call_operand.vmem [shape: f32[1,128], index: 2, kind: input, shape index: {}]   ;;  %s706_s3 = inlined_call_operand.hbm [shape: f32[128,128], index: 3, kind: input, shape index: {}]   ;;  %s707_s4 = inlined_call_operand.vmem [shape: f32[1,128], index: 4, kind: input, shape index: {}]   ;;  %s708_s5 = inlined_call_operand.hbm [shape: f32[16,128], index: 5, kind: output, shape index: {}]  }
   0x1   :  { %11 = vsyncpa [#allocation6], 0 }
   0x2   :  { %12 = vsyncpa [#allocation4], 0  ;;  %s594_s18 = smov [#allocation5]   ;;  %s595_s20 = smov [#allocation2]  }
   0x3   :  { %s30_s19 = sshll.u32 %s594_s18, 4  ;;  %s18_s21 = sshll.u32 %s595_s20, 4  ;;  %s31_s19 = int_to_ptr.vmem [resolvable:$true] %s30_s19  ;;  %s630_s21 = int_to_ptr.vmem [resolvable:$true] %s18_s21 }
   0x4   :  { %s500_s24 = scalar_lea.hbm %s704_s1, 2048 }
   0x5   :  { %p501_p0 = scmp.ne.s32.totalorder %s704_s1, %s500_s24  ;;  %p504_p1 = scmp.lt.u32.totalorder %s500_s24, %s704_s1 }
   0x7   :  { %p506_p2 = pnand %p504_p1, %p501_p0 }
   0x9   :  { %509 = shalt.err (!%p506_p2)
}
   0xa   :  { %s510_s29 = scalar_lea.vmem %s31_s19, 2048  ;;  %p515_p4 = scmp.lt.s32.totalorder %s31_s19, %s31_s19 }
   0xb   :  { %p511_p3 = scmp.ne.s32.totalorder %s31_s19, %s510_s29  ;;  %p516_p5 = scmp.lt.s32.totalorder %s510_s29, %s510_s29 }
   0xd   :  { %p517_p6 = por %p516_p5, %p515_p4 }
   0xf   :  { %p518_p7 = pnand %p517_p6, %p511_p3 }
  0x11   :  { %521 = shalt.err (!%p518_p7)
}
  0x12   :  { %s596_s30 = smov 128   ;;  %s597_s6 = smov 8  }
  0x13   :  { %36 = dma.hbm_to_vmem [thread:$0]  %s704_s1, 2048, %s31_s19, [#allocation6], %s596_s30, %s596_s30, %s597_s6  }
  0x14   :  { %s522_s11 = scalar_lea.hbm %s703_s0, 256 }
  0x15   :  { %p523_p8 = scmp.ne.s32.totalorder %s703_s0, %s522_s11  ;;  %p526_p9 = scmp.lt.u32.totalorder %s522_s11, %s703_s0 }
  0x17   :  { %p528_p10 = pnand %p526_p9, %p523_p8 }
  0x19   :  { %531 = shalt.err (!%p528_p10)
}
  0x1a   :  { %s532_s16 = scalar_lea.vmem %s630_s21, 256  ;;  %p537_p12 = scmp.lt.s32.totalorder %s630_s21, %s630_s21 }
  0x1b   :  { %p533_p11 = scmp.ne.s32.totalorder %s630_s21, %s532_s16  ;;  %p538_p13 = scmp.lt.s32.totalorder %s532_s16, %s532_s16 }
  0x1d   :  { %p539_p0 = por %p538_p13, %p537_p12 }
  0x1f   :  { %p540_p1 = pnand %p539_p0, %p533_p11 }
  0x21   :  { %543 = shalt.err (!%p540_p1)
}
  0x22   :  { %24 = dma.hbm_to_vmem [thread:$0]  %s703_s0, 256, %s630_s21, [#allocation3], %s596_s30, %s596_s30, %s597_s6  }
  0x23   :  { %s598_s18 = smov [#allocation7]   ;;  %s544_s23 = scalar_lea.hbm %s706_s3, 2048 }
  0x24   :  { %s44_s19 = sshll.u32 %s598_s18, 4  ;;  %p545_p2 = scmp.ne.s32.totalorder %s706_s3, %s544_s23  ;;  %s45_s19 = int_to_ptr.vmem [resolvable:$true] %s44_s19 }
  0x25   :  { %p548_p3 = scmp.lt.u32.totalorder %s544_s23, %s706_s3 }
  0x27   :  { %p550_p4 = pnand %p548_p3, %p545_p2 }
  0x29   :  { %553 = shalt.err (!%p550_p4)
}
  0x2a   :  { %s554_s28 = scalar_lea.vmem %s45_s19, 2048  ;;  %p559_p6 = scmp.lt.s32.totalorder %s45_s19, %s45_s19 }
  0x2b   :  { %p555_p5 = scmp.ne.s32.totalorder %s45_s19, %s554_s28  ;;  %p560_p7 = scmp.lt.s32.totalorder %s554_s28, %s554_s28 }
  0x2d   :  { %p561_p8 = por %p560_p7, %p559_p6 }
  0x2f   :  { %p562_p9 = pnand %p561_p8, %p555_p5 }
  0x31   :  { %565 = shalt.err (!%p562_p9)
}
  0x32   :  { %50 = dma.hbm_to_vmem [thread:$0]  %s706_s3, 2048, %s45_s19, [#allocation6], %s596_s30, %s596_s30, %s597_s6  }
  0x33   :  { %588 = dma.done.wait [#allocation3], 256  }
  0x34   :  { %589 = vsyncadd [#allocation3], 4294967040 }
  0x35   :  { %590 = dma.done.wait [#allocation6], 4096  }
  0x36   :  { %591 = vsyncadd [#allocation6], 4294963200  ;;  %v64_v0 = vld [vmem:[#allocation5] sm:$0xff]  ;;  %v65_v1 = vld [vmem:[#allocation5 + $0x8] sm:$0xff]  ;;  %v262_v57 = vlaneseq }
  0x37   :  { %v66_v2 = vld [vmem:[#allocation5 + $0x10] sm:$0xff]  ;;  %v422_v3 = vpack.c.bf16 %v65_v1, %v64_v0  ;;  %v67_v4 = vld [vmem:[#allocation5 + $0x18] sm:$0xff]  ;;  %v68_v6 = vld [vmem:[#allocation5 + $0x20] sm:$0xff] }
  0x38   :  { %v426_v5 = vpack.c.bf16 %v67_v4, %v66_v2  ;;  %v69_v7 = vld [vmem:[#allocation5 + $0x28] sm:$0xff]  ;;  %v70_v9 = vld [vmem:[#allocation5 + $0x30] sm:$0xff]  ;;  %v71_v10 = vld [vmem:[#allocation5 + $0x38] sm:$0xff]  ;;  %v263_v58 = vand.u32 127, %v262_v57 }
  0x39   :  { %423 = vmatprep.subr.bf16.mxu0 %v422_v3  ;;  %v430_v8 = vpack.c.bf16 %v69_v7, %v68_v6  ;;  %v62_v11 = vld [vmem:[#allocation2] sm:$0xff]  ;;  %v164_v12 = vld [vmem:[#allocation7] sm:$0xff]  ;;  %v165_v13 = vld [vmem:[#allocation7 + $0x8] sm:$0xff]  ;;  %v434_v20 = vpack.c.bf16 %v71_v10, %v70_v9 }
  0x3a   :  { %425 = vmatpush3.bf16.msra.mxu0 %v422_v3  ;;  %384 = vmatprep.mubr.f32.mxu0 %v62_v11  ;;  %v166_v14 = vld [vmem:[#allocation7 + $0x10] sm:$0xff]  ;;  %v454_v15 = vpack.c.bf16 %v165_v13, %v164_v12  ;;  %v167_v16 = vld [vmem:[#allocation7 + $0x18] sm:$0xff]  ;;  %v168_v18 = vld [vmem:[#allocation7 + $0x20] sm:$0xff]  ;;  %vm264_vm0 = vcmp.lt.s32.totalorder %v263_v58, 2  ;;  %vm291_vm1 = vcmp.eq.s32.totalorder %v263_v58, 2 }
  0x3b   :  { %427 = vmatprep.subr.bf16.mxu0 %v426_v5  ;;  %v458_v17 = vpack.c.bf16 %v167_v16, %v166_v14  ;;  %v169_v19 = vld [vmem:[#allocation7 + $0x28] sm:$0xff]  ;;  %v72_v21 = vld [vmem:[#allocation5 + $0x40] sm:$0xff]  ;;  %v170_v24 = vld [vmem:[#allocation7 + $0x30] sm:$0xff] }
  0x3c   :  { %455 = vmatprep.subr.bf16.mxu1 %v454_v15  ;;  %v73_v22 = vld [vmem:[#allocation5 + $0x48] sm:$0xff]  ;;  %v462_v23 = vpack.c.bf16 %v169_v19, %v168_v18  ;;  %v171_v25 = vld [vmem:[#allocation7 + $0x38] sm:$0xff]  ;;  %v74_v27 = vld [vmem:[#allocation5 + $0x50] sm:$0xff] }
  0x3d   :  { %457 = vmatpush3.bf16.msra.mxu1 %v454_v15  ;;  %v438_v26 = vpack.c.bf16 %v73_v22, %v72_v21  ;;  %v75_v28 = vld [vmem:[#allocation5 + $0x58] sm:$0xff]  ;;  %v466_v29 = vpack.c.bf16 %v171_v25, %v170_v24  ;;  %v172_v30 = vld [vmem:[#allocation7 + $0x40] sm:$0xff]  ;;  %v173_v31 = vld [vmem:[#allocation7 + $0x48] sm:$0xff] }
  0x3e   :  { %429 = vmatpush3.bf16.msra.mxu0 %v426_v5  ;;  %459 = vmatprep.subr.bf16.mxu1 %v458_v17  ;;  %v442_v32 = vpack.c.bf16 %v75_v28, %v74_v27  ;;  %v76_v33 = vld [vmem:[#allocation5 + $0x60] sm:$0xff]  ;;  %v77_v34 = vld [vmem:[#allocation5 + $0x68] sm:$0xff]  ;;  %v470_v35 = vpack.c.bf16 %v173_v31, %v172_v30  ;;  %v174_v36 = vld [vmem:[#allocation7 + $0x50] sm:$0xff] }
  0x3f   :  { %431 = vmatprep.subr.bf16.mxu0 %v430_v8  ;;  %v175_v37 = vld [vmem:[#allocation7 + $0x58] sm:$0xff]  ;;  %v446_v38 = vpack.c.bf16 %v77_v34, %v76_v33  ;;  %v78_v39 = vld [vmem:[#allocation5 + $0x70] sm:$0xff]  ;;  %v176_v42 = vld [vmem:[#allocation7 + $0x60] sm:$0xff] }
  0x40   :  { %v79_v40 = vld [vmem:[#allocation5 + $0x78] sm:$0xff]  ;;  %v474_v41 = vpack.c.bf16 %v175_v37, %v174_v36  ;;  %v177_v43 = vld [vmem:[#allocation7 + $0x68] sm:$0xff]  ;;  %v178_v47 = vld [vmem:[#allocation7 + $0x70] sm:$0xff] }
  0x41   :  { %461 = vmatpush3.bf16.msra.mxu1 %v458_v17  ;;  %v450_v44 = vpack.c.bf16 %v79_v40, %v78_v39  ;;  %v478_v45 = vpack.c.bf16 %v177_v43, %v176_v42  ;;  %v63_v46 = vld [vmem:[#allocation2 + $0x8] sm:$0xff]  ;;  %v314_v50 = vld [vmem:[%s705_s2] ss:$0 sm:$0xff]  ;;  %s599_s2 = smov [#allocation8]  }
  0x42   :  { %433 = vmatpush3.bf16.msra.mxu0 %v430_v8  ;;  %463 = vmatprep.subr.bf16.mxu1 %v462_v23  ;;  %v179_v48 = vld [vmem:[#allocation7 + $0x78] sm:$0xff]  ;;  %v315_v59 = vld [vmem:[%s707_s4] ss:$0 sm:$0xff]  ;;  %s301_s4 = sshll.u32 %s599_s2, 4  ;;  %s302_s4 = int_to_ptr.vmem [resolvable:$true] %s301_s4 }
  0x43   :  { %435 = vmatprep.subr.bf16.mxu0 %v434_v20  ;;  %v482_v49 = vpack.c.bf16 %v179_v48, %v178_v47  ;;  %s566_s9 = scalar_lea.vmem %s302_s4, 256  ;;  %p571_p11 = scmp.lt.s32.totalorder %s302_s4, %s302_s4 }
  0x44   :  { %p567_p10 = scmp.ne.s32.totalorder %s302_s4, %s566_s9  ;;  %p572_p12 = scmp.lt.s32.totalorder %s566_s9, %s566_s9 }
  0x45   :  { %465 = vmatpush3.bf16.msra.mxu1 %v462_v23 }
  0x46   :  { %437 = vmatpush3.bf16.msra.mxu0 %v434_v20  ;;  %467 = vmatprep.subr.bf16.mxu1 %v466_v29  ;;  %p573_p13 = por %p572_p12, %p571_p11 }
  0x47   :  { %439 = vmatprep.subr.bf16.mxu0 %v438_v26 }
  0x48   :  { %p574_p0 = pnand %p573_p13, %p567_p10 }
  0x49   :  { %469 = vmatpush3.bf16.msra.mxu1 %v466_v29 }
  0x4a   :  { %441 = vmatpush3.bf16.msra.mxu0 %v438_v26  ;;  %471 = vmatprep.subr.bf16.mxu1 %v470_v35 }
  0x4b   :  { %443 = vmatprep.subr.bf16.mxu0 %v442_v32 }
  0x4d   :  { %473 = vmatpush3.bf16.msra.mxu1 %v470_v35 }
  0x4e   :  { %445 = vmatpush3.bf16.msra.mxu0 %v442_v32  ;;  %475 = vmatprep.subr.bf16.mxu1 %v474_v41 }
  0x4f   :  { %447 = vmatprep.subr.bf16.mxu0 %v446_v38 }
  0x51   :  { %477 = vmatpush3.bf16.msra.mxu1 %v474_v41 }
  0x52   :  { %449 = vmatpush3.bf16.msra.mxu0 %v446_v38  ;;  %479 = vmatprep.subr.bf16.mxu1 %v478_v45 }
  0x53   :  { %451 = vmatprep.subr.bf16.mxu0 %v450_v44 }
  0x55   :  { %481 = vmatpush3.bf16.msra.mxu1 %v478_v45 }
  0x56   :  { %453 = vmatpush3.bf16.msra.mxu0 %v450_v44  ;;  %483 = vmatprep.subr.bf16.mxu1 %v482_v49 }
  0x59   :  { %385 = vmatmul.mubr.f32.vlgmr.msra.gmra.mrb[0].mxu0 %v63_v46  ;;  %485 = vmatpush3.bf16.msra.mxu1 %v482_v49 }
 0x12c   :  { %v386_v51 = vpop.f32.mrb[0].mxu0 }
 0x12d   :  { %v159_v52 = vadd.f32 %v386_v51, %v314_v50  ;;  %v153_v53 = vpop.f32.mrb[1].mxu0 }
 0x12e   :  { %v154_v54 = vadd.f32 %v314_v50, %v153_v53 }
 0x12f   :  { %v163_v56 = vmax.f32 %v159_v52, 0.0 }
 0x130   :  { %v162_v55 = vmax.f32 %v154_v54, 0.0 }
 0x132   :  { %419 = vmatprep.mubr.f32.mxu1 %v162_v55 }
 0x133   :  { %420 = vmatmul.mubr.f32.vlgmr.msra.gmra.mrb[0].mxu1 %v163_v56 }
 0x206   :  { %v421_v60 = vpop.f32.mrb[0].mxu1 }
 0x207   :  { %v253_v61 = vpop.f32.mrb[1].mxu1  ;;  %v259_v63 = vadd.f32 %v421_v60, %v315_v59 }
 0x208   :  { %v254_v62 = vadd.f32 %v315_v59, %v253_v61 }
 0x209   :  { %v266_v1 = vsel %vm264_vm0, %v259_v63, -1e+30 }
 0x20a   :  { %v265_v0 = vsel %vm264_vm0, %v254_v62, -1e+30 }
 0x20b   :  { %267 = vmax.xlane.f32.xlu0 %v265_v0 }
 0x20f   :  { %269 = vmax.xlane.f32.xlu0 %v266_v1 }
 0x298   :  { %v268_v2 = vpop.xlane.xlu0 %267 }
 0x299   :  { %v271_v3 = vsub.f32 %v265_v0, %v268_v2 }
 0x29b   :  { %v273_v4 = vmul.f32 1.442695, %v271_v3 }
 0x29c   :  { %v270_v5 = vpop.xlane.xlu0 %269 }
 0x29d   :  { %492 = vpow2.f32 %v273_v4  ;;  %v272_v6 = vsub.f32 %v266_v1, %v270_v5 }
 0x29f   :  { %v275_v7 = vmul.f32 1.442695, %v272_v6 }
 0x2a1   :  { %494 = vpow2.f32 %v275_v7 }
 0x2a7   :  { %v493_v8 = vpop.eup %492 }
 0x2a8   :  { %277 = vadd.xlane.f32.xlu1 %v493_v8 }
 0x2ab   :  { %v495_v9 = vpop.eup %494 }
 0x2ac   :  { %279 = vadd.xlane.f32.xlu1 %v495_v9 }
 0x335   :  { %v278_v10 = vpop.xlane.xlu1 %277 }
 0x336   :  { %496 = vrcp.f32 %v278_v10 }
 0x339   :  { %v280_v11 = vpop.xlane.xlu1 %279 }
 0x33a   :  { %498 = vrcp.f32 %v280_v11 }
 0x340   :  { %v497_v12 = vpop.eup %496 }
 0x341   :  { %v283_v13 = vmul.f32 %v497_v12, %v278_v10 }
 0x343   :  { %v285_v14 = vsub.f32 2.0, %v283_v13 }
 0x344   :  { %v499_v15 = vpop.eup %498 }
 0x345   :  { %v287_v16 = vmul.f32 %v497_v12, %v285_v14  ;;  %v284_v17 = vmul.f32 %v499_v15, %v280_v11 }
 0x347   :  { %v289_v18 = vmul.f32 %v493_v8, %v287_v16  ;;  %v286_v19 = vsub.f32 2.0, %v284_v17 }
 0x349   :  { %v288_v20 = vmul.f32 %v499_v15, %v286_v19  ;;  %v292_v21 = vsel %vm291_vm1, %v254_v62, %v289_v18 }
 0x34a   :  { %294 = vst [vmem:[#allocation8] sm:$0xff] %v292_v21 }
 0x34b   :  { %v290_v22 = vmul.f32 %v495_v9, %v288_v20 }
 0x34d   :  { %v293_v23 = vsel %vm291_vm1, %v259_v63, %v290_v22 }
 0x34e   :  { %295 = vst [vmem:[#allocation8 + $0x8] sm:$0xff] %v293_v23 }
 0x34f   :  { %577 = shalt.err (!%p574_p0)
}
 0x350   :  { %s578_s12 = scalar_lea.hbm %s708_s5, 256 }
 0x351   :  { %p579_p1 = scmp.ne.s32.totalorder %s708_s5, %s578_s12  ;;  %p582_p2 = scmp.lt.u32.totalorder %s578_s12, %s708_s5 }
 0x353   :  { %p584_p3 = pnand %p582_p2, %p579_p1 }
 0x355   :  { %587 = shalt.err (!%p584_p3)
}
 0x356   :  { %307 = dma.vmem_to_hbm [thread:$0]  %s302_s4, 256, %s708_s5, [#allocation4], %s596_s30, %s596_s30, %s597_s6  }
 0x357   :  { %592 = dma.done.wait [#allocation4], 256  }
 0x358   :  { %593 = vsyncadd [#allocation4], 4294967040 }
 0x359   :  { %311 = vsyncpa [#allocation3], 1 }
 0x35a   :  { %312 = vsyncpa [#allocation6], 1 }
 0x35b   :  { %313 = vsyncpa [#allocation4], 1 }

</bundles_post_ra>
